<compile_context>
chip_gen: v5e
topology: v5e:2x2
jax: 0.10.0
libtpu: 0.0.40
codegen_flags: <defaults>
</compile_context>

<pallas_src>
import functools

import jax
import jax.numpy as jnp
from jax.experimental import pallas as pl
from jax.experimental.pallas import tpu as pltpu

_LANE = 128


def _fake_quant_kernel(x_ref, o_ref, *, inv_scale, scale, qmin_z, qmax_z):
    x = x_ref[...].astype(jnp.float32)
    # jnp.round = round-half-to-even, matching torch's nearbyint.
    # zero_point is folded into the clip bounds (exact rearrangement of
    # clamp(round(x*inv_scale) + zp, qmin, qmax) - zp).
    q = jnp.clip(jnp.round(x * inv_scale), qmin_z, qmax_z)
    o_ref[...] = (q * scale).astype(o_ref.dtype)


def _pick_width(n):
    """Largest lane-dense width that divides the element count exactly."""
    for w in (4096, 2048, 1024, 512, 256, 128):
        if n % w == 0:
            return w
    return None


def _chip_tuning():
    """Returns (target bytes per block buffer, vmem_limit_bytes)."""
    try:
        vmem_cap = int(pltpu.get_tpu_info().vmem_capacity_bytes)
    except Exception:
        vmem_cap = 128 * 1024 * 1024
    if vmem_cap <= 64 * 1024 * 1024:
        # v7x-class: 3.2 TB/s HBM makes per-step overhead relatively expensive;
        # use 8 MiB blocks (32 MiB double-buffered in+out) under 64 MiB VMEM.
        return 8 * 1024 * 1024, 40 * 1024 * 1024
    # v5e / v6e: 4 MiB blocks, 32 MiB scoped VMEM (v5e default is only 16 MiB).
    return 4 * 1024 * 1024, 32 * 1024 * 1024


@functools.partial(jax.jit, static_argnums=(1, 2, 3, 4))
def _per_tensor_fake_quant_impl(x, scale, zero_point, quant_min, quant_max):
    orig_shape = x.shape
    orig_dtype = x.dtype
    n = int(x.size)

    scale_f = float(scale)
    zp_f = float(zero_point)
    inv_scale = 1.0 / scale_f
    qmin_z = float(quant_min) - zp_f
    qmax_z = float(quant_max) - zp_f

    def _jnp_fq(v):
        q = jnp.clip(jnp.round(v.astype(jnp.float32) * inv_scale), qmin_z, qmax_z)
        return (q * scale_f).astype(orig_dtype)

    W = _pick_width(n)
    if n == 0 or n < 8 * _LANE or W is None:
        # Tiny or lane-ragged element count: a single fused XLA elementwise op
        # is already 1 HBM read + 1 write (the roofline) and avoids any
        # pad / prefix-slice / concatenate passes around a kernel launch.
        return _jnp_fq(x)

    rows = n // W
    itemsize = jnp.dtype(orig_dtype).itemsize
    sub = max(8, 32 // itemsize)  # sublane packing: 8 f32, 16 bf16, 32 int8

    target_block_bytes, vmem_limit = _chip_tuning()
    br = max(sub, (target_block_bytes // (W * itemsize)) // sub * sub)

    if rows <= br:
        if n * itemsize > (1 << 20) and rows >= 2 * sub:
            # Ensure >= 2 grid steps so the "parallel" axis can shard across
            # both TensorCores on dual-TC chips; negligible cost elsewhere.
            half = (rows + 1) // 2
            block_rows = ((half + sub - 1) // sub) * sub
        else:
            block_rows = rows  # single full-extent block
    else:
        block_rows = br

    grid = (pl.cdiv(rows, block_rows),)

    kernel = functools.partial(
        _fake_quant_kernel,
        inv_scale=inv_scale,
        scale=scale_f,
        qmin_z=qmin_z,
        qmax_z=qmax_z,
    )

    cost = pl.CostEstimate(
        flops=4 * n,
        transcendentals=0,
        bytes_accessed=2 * n * itemsize,
    )

    # Contiguous reshape -> bitcast under jit; no data movement.
    x2d = x.reshape(rows, W)

    out2d = pl.pallas_call(
        kernel,
        out_shape=jax.ShapeDtypeStruct((rows, W), orig_dtype),
        grid_spec=pltpu.PrefetchScalarGridSpec(
            num_scalar_prefetch=0,
            grid=grid,
            in_specs=[pl.BlockSpec((block_rows, W), lambda i: (i, 0))],
            out_specs=pl.BlockSpec((block_rows, W), lambda i: (i, 0)),
        ),
        compiler_params=pltpu.CompilerParams(
            dimension_semantics=("parallel",),
            vmem_limit_bytes=vmem_limit,
        ),
        cost_estimate=cost,
    )(x2d)

    return out2d.reshape(orig_shape)


def per_tensor_fake_quant(x, scale, zero_point, quant_min, quant_max):
    """Per-tensor affine fake quantization (PyTorch PerTensorFakeQuant.forward)."""
    # scale / zero_point / quant_min / quant_max are static module config (as
    # in the PyTorch module's __init__).  If they ever become traced device
    # values they should instead be passed as SMEM scalar operands.
    return _per_tensor_fake_quant_impl(
        x, float(scale), int(zero_point), int(quant_min), int(quant_max)
    )


def reference_fake_quant(x, scale, zero_point, quant_min, quant_max):
    inv_scale = 1.0 / float(scale)
    q = jnp.round(x.astype(jnp.float32) * inv_scale) + float(zero_point)
    q = jnp.clip(q, float(quant_min), float(quant_max))
    return ((q - float(zero_point)) * float(scale)).astype(x.dtype)


if __name__ == "__main__":
    # Deterministic module config (typical int8 affine quant).
    scale = 0.05
    zero_point = 3
    quant_min = -128
    quant_max = 127

    key = jax.random.PRNGKey(0)
    k1, k2, k3 = jax.random.split(key, 3)

    # Primary test: NCHW input (n = 2048, lane-aligned -> Pallas kernel path).
    x = jax.random.normal(k1, (2, 4, 16, 16), dtype=jnp.float32)
    out = jax.block_until_ready(
        per_tensor_fake_quant(x, scale, zero_point, quant_min, quant_max))
    ref = reference_fake_quant(x, scale, zero_point, quant_min, quant_max)
    assert out.shape == x.shape and out.dtype == x.dtype
    assert jnp.allclose(out, ref, atol=1e-6), "mismatch vs reference (aligned)"

    # Multi-block test: 2 MiB activation exercising the multi-step parallel grid.
    xb = jax.random.normal(k2, (2, 64, 64, 64), dtype=jnp.float32)
    outb = jax.block_until_ready(
        per_tensor_fake_quant(xb, scale, zero_point, quant_min, quant_max))
    refb = reference_fake_quant(xb, scale, zero_point, quant_min, quant_max)
    assert outb.shape == xb.shape and outb.dtype == xb.dtype
    assert jnp.allclose(outb, refb, atol=1e-6), "mismatch vs reference (multi-block)"

    # Ragged element count (n = 1326, not a multiple of 128) -> fused jnp path,
    # still exactly matching the reference with zero extra HBM passes.
    x2 = jax.random.normal(k3, (2, 3, 17, 13), dtype=jnp.float32)
    out2 = jax.block_until_ready(
        per_tensor_fake_quant(x2, scale, zero_point, quant_min, quant_max))
    ref2 = reference_fake_quant(x2, scale, zero_point, quant_min, quant_max)
    assert out2.shape == x2.shape and out2.dtype == x2.dtype
    assert jnp.allclose(out2, ref2, atol=1e-6), "mismatch vs reference (ragged)"

    print("KERNEL_OK")
</pallas_src>

<mosaic_0001>
module attributes {stable_mosaic.version = 11 : i64} {
  func.func @_fake_quant_kernel(%arg0: i32, %arg1: memref<1x2048xf32, #tpu.memory_space<vmem>>, %arg2: memref<1x2048xf32, #tpu.memory_space<vmem>>) attributes {dimension_semantics = [#tpu.dimension_semantics<parallel>], iteration_bounds = array<i64: 1>, scalar_prefetch = 0 : i64, scratch_operands = 0 : i64, tpu.core_type = #tpu.core_type<tc>, window_params = [{transform_indices = @transform_0, window_bounds = array<i64: 1, 2048>}, {transform_indices = @transform_1, window_bounds = array<i64: 1, 2048>}]} {
    %c0 = arith.constant 0 : index
    %c0_0 = arith.constant 0 : index
    %0 = vector.load %arg1[%c0, %c0_0] : memref<1x2048xf32, #tpu.memory_space<vmem>>, vector<1x2048xf32>
    %cst = arith.constant 2.000000e+01 : f32
    %1 = vector.broadcast %cst : f32 to vector<1x2048xf32>
    %2 = arith.mulf %0, %1 : vector<1x2048xf32>
    %3 = math.roundeven %2 : vector<1x2048xf32>
    %cst_1 = arith.constant -1.310000e+02 : f32
    %cst_2 = arith.constant 1.240000e+02 : f32
    %4 = vector.broadcast %cst_1 : f32 to vector<1x2048xf32>
    %5 = arith.maximumf %4, %3 : vector<1x2048xf32>
    %6 = vector.broadcast %cst_2 : f32 to vector<1x2048xf32>
    %7 = arith.minimumf %6, %5 : vector<1x2048xf32>
    %cst_3 = arith.constant 5.000000e-02 : f32
    %8 = vector.broadcast %cst_3 : f32 to vector<1x2048xf32>
    %9 = arith.mulf %7, %8 : vector<1x2048xf32>
    %c0_4 = arith.constant 0 : index
    %c0_5 = arith.constant 0 : index
    %10 = vector.load %arg2[%c0_4, %c0_5] : memref<1x2048xf32, #tpu.memory_space<vmem>>, vector<1x2048xf32>
    tpu.vector_store %arg2[%c0_4, %c0_5], %9 {strides = array<i32>} : memref<1x2048xf32, #tpu.memory_space<vmem>>, vector<1x2048xf32>,
    return
  }
  func.func @transform_0(%arg0: i32) -> (i32, i32) {
    %c0_i32 = arith.constant 0 : i32
    %c0_i32_0 = arith.constant 0 : i32
    return %arg0, %c0_i32 : i32, i32
  }
  func.func @transform_1(%arg0: i32) -> (i32, i32) {
    %c0_i32 = arith.constant 0 : i32
    %c0_i32_0 = arith.constant 0 : i32
    return %arg0, %c0_i32 : i32, i32
  }
}

</mosaic_0001>

<bundles_post_ra>
// kernel: _per_tensor_fake_quant_impl.1
= control target key start
LH: loop header
LB: loop body
LE: loop exit
PB: predicated region body
PF: predicated region fallthrough
CT: control target
= control target key end

     0   :  { %s64_s0 = inlined_call_operand.vmem [shape: f32[1,2048], index: 0, kind: input, shape index: {}]   ;;  %s65_s1 = inlined_call_operand.vmem [shape: f32[1,2048], index: 1, kind: output, shape index: {}]  }
   0x1   :  { %v8_v0 = vld [vmem:[%s64_s0] sm:$0xff]  ;;  %v9_v1 = vld [vmem:[%s64_s0 + $0x8] sm:$0xff] }
   0x2   :  { %v10_v2 = vmul.f32 20.0, %v8_v0  ;;  %v11_v3 = vmul.f32 20.0, %v9_v1 }
   0x4   :  { %v28_v4 = vcvt.f32.s32 %v10_v2  ;;  %v26_v5 = vand.u32 2147483647, %v10_v2  ;;  %v36_v6 = vcvt.f32.s32 %v11_v3  ;;  %v31_v8 = vand.u32 2147483648, %v10_v2 }
   0x5   :  { %v34_v9 = vand.u32 2147483647, %v11_v3  ;;  %v39_v11 = vand.u32 2147483648, %v11_v3 }
   0x6   :  { %v29_v7 = vcvt.s32.f32 %v28_v4  ;;  %v37_v10 = vcvt.s32.f32 %v36_v6  ;;  %vm27_vm0 = vcmp.lt.f32.partialorder %v26_v5, 8388608.0 }
   0x7   :  { %vm35_vm1 = vcmp.lt.f32.partialorder %v34_v9, 8388608.0 }
   0x8   :  { %v30_v12 = vand.u32 2147483647, %v29_v7  ;;  %v38_v13 = vand.u32 2147483647, %v37_v10 }
   0xa   :  { %v32_v14 = vor.u32 %v31_v8, %v30_v12  ;;  %v40_v15 = vor.u32 %v39_v11, %v38_v13 }
   0xc   :  { %v33_v16 = vsel %vm27_vm0, %v32_v14, %v10_v2  ;;  %v41_v18 = vsel %vm35_vm1, %v40_v15, %v11_v3 }
   0xd   :  { %v14_v17 = vmax.f32 %v33_v16, -131.0  ;;  %v15_v19 = vmax.f32 %v41_v18, -131.0 }
   0xf   :  { %v16_v20 = vmin.f32 %v14_v17, 124.0  ;;  %v17_v21 = vmin.f32 %v15_v19, 124.0 }
  0x11   :  { %v18_v22 = vmul.f32 0.05, %v16_v20  ;;  %v19_v23 = vmul.f32 0.05, %v17_v21 }
  0x13   :  { %20 = vst [vmem:[%s65_s1] sm:$0xff] %v18_v22 }
  0x14   :  { %21 = vst [vmem:[%s65_s1 + $0x8] sm:$0xff] %v19_v23 }

</bundles_post_ra>
